<compile_context>
chip_gen: v5e
topology: v5e:2x2
jax: 0.10.0
libtpu: 0.0.40
codegen_flags: <defaults>
</compile_context>

<pallas_src>
import functools

import jax
import jax.numpy as jnp
from jax.experimental import pallas as pl
from jax.experimental.pallas import tpu as pltpu


def _is_pow2(n):
    return n > 0 and (n & (n - 1)) == 0


def approx_repset_kernel(x_ref, wc_ref, w1_ref, b1_ref, w2_ref, b2_ref,
                         out_ref, acc_ref, *, n_hidden_sets, n_elements,
                         full_width):
    # x_ref : (TILE_B, TILE_S, d) bf16     wc_ref: (d, H*E) bf16
    # w1_ref: (ACC_W, 32) f32 (rows >= H zero-padded when full_width)
    # b1_ref: (1, 32) f32    w2_ref: (32, C) f32    b2_ref: (1, C) f32
    # out_ref: (TILE_B, C) f32   acc_ref: (TILE_B, ACC_W) f32 scratch
    H = n_hidden_sets
    E = n_elements
    tb, ts, d = x_ref.shape

    set_idx = pl.program_id(1)
    n_set_steps = pl.num_programs(1)

    @pl.when(set_idx == 0)
    def _():
        acc_ref[...] = jnp.zeros_like(acc_ref)

    # --- t = relu(X @ Wc)  (bf16 inputs, f32 accumulation on the MXU) --------
    # Leading-dim collapse (tb, ts, d) -> (tb*ts, d) is layout-free when
    # ts % 8 == 0, and gives one big MXU matmul instead of tb small ones.
    x = x_ref[...].reshape(tb * ts, d)
    t = jnp.dot(x, wc_ref[...], preferred_element_type=jnp.float32)
    t = jnp.maximum(t, 0.0)                                # (rows, H*E) f32

    # --- max over the n_elements axis ----------------------------------------
    # torch view(B, S, E, H): column c -> (e = c // H, h = c % H), i.e. the
    # values for hidden unit h are the columns congruent to h (mod H).
    if E == 1:
        m = t                                              # (rows, H)
    elif full_width:
        # log2(E) rotate-and-max tree: after shifts H*E/2, ..., H every lane i
        # holds the max over its residue class (i mod H).  Lanes >= H are
        # duplicates; the zero-padded fc1 weight rows cancel them later, so we
        # keep the full 128-wide vregs (no masked narrow slice per step).
        m = t
        shift = (H * E) // 2
        while shift >= H:
            m = jnp.maximum(m, pltpu.roll(m, shift=shift, axis=m.ndim - 1))
            shift //= 2                                    # (rows, H*E)
    else:
        # Fallback for non-power-of-2 E: unrolled slice/max.
        m = t[:, 0:H]
        for e in range(1, E):
            m = jnp.maximum(m, t[:, e * H:(e + 1) * H])    # (rows, H)

    # --- partial sum over this set tile, folded into the accumulator ---------
    acc_w = acc_ref.shape[-1]
    acc_ref[...] += jnp.sum(m.reshape(tb, ts, acc_w), axis=1)

    # --- epilogue: fc1 + relu, fc2, log_softmax, output write ----------------
    @pl.when(set_idx == n_set_steps - 1)
    def _():
        s = acc_ref[...]                                   # (TILE_B, ACC_W)
        h = jnp.dot(s, w1_ref[...], preferred_element_type=jnp.float32)
        h = jnp.maximum(h + b1_ref[...], 0.0)              # (TILE_B, 32)
        o = jnp.dot(h, w2_ref[...], preferred_element_type=jnp.float32)
        o = o + b2_ref[...]                                # (TILE_B, C)
        o_max = jnp.max(o, axis=-1, keepdims=True)
        lse = o_max + jnp.log(jnp.sum(jnp.exp(o - o_max), axis=-1,
                                      keepdims=True))
        out_ref[...] = (o - lse).astype(out_ref.dtype)


def _choose_tile(n, target):
    """Largest t <= target that divides n and is a multiple of 8 (or == n)."""
    if n <= target:
        return n
    for t in range(min(target, n), 0, -1):
        if n % t == 0 and (t % 8 == 0 or t == n):
            return t
    return n


def approx_rep_set_forward(X, Wc, fc1_w, fc1_b, fc2_w, fc2_b, *,
                           n_hidden_sets, n_elements,
                           tile_b=None, tile_s=None):
    """X: (B, S, d). fc1_w: (32, H), fc2_w: (C, 32) in PyTorch (out, in) layout."""
    B, S, d = X.shape
    H, E = n_hidden_sets, n_elements
    hidden = fc1_w.shape[0]                 # 32
    C = fc2_w.shape[0]
    assert Wc.shape == (d, H * E)

    if tile_b is None:
        tile_b = _choose_tile(B, 8)
    if tile_s is None:
        # ~1024 rows per X tile amortizes MXU weight-load/drain and gives the
        # DMA pipeline large, lane-dense transfers.
        tile_s = _choose_tile(S, max(8, 1024 // max(tile_b, 1)))
    assert B % tile_b == 0 and (tile_b % 8 == 0 or tile_b == B), tile_b
    assert S % tile_s == 0 and (tile_s % 8 == 0 or tile_s == S), tile_s

    full_width = _is_pow2(E)
    acc_w = H * E if full_width else H

    # bf16 inputs to the big matmul (f32 accumulation inside the kernel).
    x_bf = X.astype(jnp.bfloat16)
    wc_bf = Wc.astype(jnp.bfloat16)
    w1 = fc1_w.T.astype(jnp.float32)              # (H, 32)
    if acc_w > H:
        # Zero rows cancel the duplicate lanes kept by the full-width max.
        w1 = jnp.concatenate(
            [w1, jnp.zeros((acc_w - H, hidden), jnp.float32)], axis=0)
    b1 = fc1_b.reshape(1, -1).astype(jnp.float32)
    w2 = fc2_w.T.astype(jnp.float32)              # (32, C)
    b2 = fc2_b.reshape(1, -1).astype(jnp.float32)

    grid = (B // tile_b, S // tile_s)

    # Rough VMEM budget (double-buffered tiles + resident weights + temps),
    # clamped so it also fits v7x's smaller (64 MiB) VMEM.
    rows = tile_b * tile_s
    est = (2 * rows * d * 2                  # X tile, bf16, double-buffered
           + 2 * d * H * E * 2               # Wc (resident)
           + 2 * (acc_w * hidden + hidden + hidden * C + C) * 4
           + 2 * tile_b * C * 4              # output tile
           + tile_b * acc_w * 4              # accumulator scratch
           + 8 * rows * H * E * 4)           # in-kernel f32 temporaries
    vmem_limit = int(min(max(2 * est, 16 * 2**20), 48 * 2**20))

    kernel = functools.partial(approx_repset_kernel,
                               n_hidden_sets=H, n_elements=E,
                               full_width=full_width)

    return pl.pallas_call(
        kernel,
        out_shape=jax.ShapeDtypeStruct((B, C), jnp.float32),
        grid_spec=pltpu.PrefetchScalarGridSpec(
            num_scalar_prefetch=0,
            grid=grid,
            in_specs=[
                pl.BlockSpec((tile_b, tile_s, d), lambda bi, si: (bi, si, 0)),
                # Weights/biases: constant block index -> DMA'd once, resident.
                pl.BlockSpec((d, H * E), lambda bi, si: (0, 0)),
                pl.BlockSpec((acc_w, hidden), lambda bi, si: (0, 0)),
                pl.BlockSpec((1, hidden), lambda bi, si: (0, 0)),
                pl.BlockSpec((hidden, C), lambda bi, si: (0, 0)),
                pl.BlockSpec((1, C), lambda bi, si: (0, 0)),
            ],
            out_specs=pl.BlockSpec((tile_b, C), lambda bi, si: (bi, 0)),
            scratch_shapes=[pltpu.VMEM((tile_b, acc_w), jnp.float32)],
        ),
        compiler_params=pltpu.CompilerParams(
            dimension_semantics=("parallel", "arbitrary"),
            vmem_limit_bytes=vmem_limit,
        ),
    )(x_bf, wc_bf, w1, b1, w2, b2)


def _reference_forward(X, Wc, fc1_w, fc1_b, fc2_w, fc2_b,
                       n_hidden_sets, n_elements):
    B, S, _ = X.shape
    # Apply the same bf16 input rounding the kernel uses (accumulation is f32).
    Xq = X.astype(jnp.bfloat16).astype(jnp.float32)
    Wcq = Wc.astype(jnp.bfloat16).astype(jnp.float32)
    hi = jax.lax.Precision.HIGHEST
    t = jax.nn.relu(jnp.einsum('bsd,de->bse', Xq, Wcq, precision=hi))
    t = t.reshape(B, S, n_elements, n_hidden_sets)
    t = jnp.max(t, axis=2)
    t = jnp.sum(t, axis=1)
    t = jax.nn.relu(jnp.dot(t, fc1_w.T, precision=hi) + fc1_b)
    out = jnp.dot(t, fc2_w.T, precision=hi) + fc2_b
    return jax.nn.log_softmax(out, axis=1)


if __name__ == "__main__":
    # Small shapes consistent with the module.
    B, S, d = 16, 32, 32
    n_hidden_sets, n_elements, n_classes = 16, 8, 4

    key = jax.random.PRNGKey(0)
    k_x, k_wc, k_w1, k_b1, k_w2, k_b2 = jax.random.split(key, 6)

    X = jax.random.normal(k_x, (B, S, d), jnp.float32)

    # Wc ~ Uniform(-1, 1), shape (d, n_hidden_sets * n_elements)
    Wc = jax.random.uniform(k_wc, (d, n_hidden_sets * n_elements),
                            jnp.float32, -1.0, 1.0)
    # nn.Linear-style init (uniform(-1/sqrt(fan_in), 1/sqrt(fan_in)))
    bnd1 = 1.0 / jnp.sqrt(n_hidden_sets)
    fc1_w = jax.random.uniform(k_w1, (32, n_hidden_sets), jnp.float32, -bnd1, bnd1)
    fc1_b = jax.random.uniform(k_b1, (32,), jnp.float32, -bnd1, bnd1)
    bnd2 = 1.0 / jnp.sqrt(32.0)
    fc2_w = jax.random.uniform(k_w2, (n_classes, 32), jnp.float32, -bnd2, bnd2)
    fc2_b = jax.random.uniform(k_b2, (n_classes,), jnp.float32, -bnd2, bnd2)

    ref = _reference_forward(X, Wc, fc1_w, fc1_b, fc2_w, fc2_b,
                             n_hidden_sets, n_elements)

    # 1) performance-default tiling (single set step per batch tile).
    out_default = approx_rep_set_forward(
        X, Wc, fc1_w, fc1_b, fc2_w, fc2_b,
        n_hidden_sets=n_hidden_sets, n_elements=n_elements)
    out_default = jax.block_until_ready(out_default)

    # 2) explicit small tiles: exercises the (batch, set) grid, the scratch
    #    accumulator across set steps, and the epilogue gating.
    out_tiled = approx_rep_set_forward(
        X, Wc, fc1_w, fc1_b, fc2_w, fc2_b,
        n_hidden_sets=n_hidden_sets, n_elements=n_elements,
        tile_b=8, tile_s=8)
    out_tiled = jax.block_until_ready(out_tiled)

    assert out_default.shape == (B, n_classes)
    assert out_tiled.shape == (B, n_classes)
    # bf16 matmul inputs -> tolerance looser than the pure-f32 version.
    assert jnp.allclose(out_default, ref, atol=2e-2, rtol=2e-3), (out_default, ref)
    assert jnp.allclose(out_tiled, ref, atol=2e-2, rtol=2e-3), (out_tiled, ref)

    print("KERNEL_OK")
</pallas_src>

<mosaic_0001>
module attributes {stable_mosaic.version = 11 : i64} {
  func.func @approx_repset_kernel(%arg0: i32, %arg1: i32, %arg2: memref<8x32x32xbf16, #tpu.memory_space<vmem>>, %arg3: memref<32x128xbf16, #tpu.memory_space<vmem>>, %arg4: memref<128x32xf32, #tpu.memory_space<vmem>>, %arg5: memref<1x32xf32, #tpu.memory_space<vmem>>, %arg6: memref<32x4xf32, #tpu.memory_space<vmem>>, %arg7: memref<1x4xf32, #tpu.memory_space<vmem>>, %arg8: memref<8x4xf32, #tpu.memory_space<vmem>>, %arg9: memref<8x128xf32, #tpu.memory_space<vmem>>) attributes {dimension_semantics = [#tpu.dimension_semantics<parallel>, #tpu.dimension_semantics<arbitrary>], iteration_bounds = array<i64: 2, 1>, scalar_prefetch = 0 : i64, scratch_operands = 1 : i64, tpu.core_type = #tpu.core_type<tc>, window_params = [{transform_indices = @transform_0, window_bounds = array<i64: 8, 32, 32>}, {pipeline_mode = #tpu.pipeline_mode<synchronous>, transform_indices = @transform_1, window_bounds = array<i64: 32, 128>}, {pipeline_mode = #tpu.pipeline_mode<synchronous>, transform_indices = @transform_2, window_bounds = array<i64: 128, 32>}, {pipeline_mode = #tpu.pipeline_mode<synchronous>, transform_indices = @transform_3, window_bounds = array<i64: 1, 32>}, {pipeline_mode = #tpu.pipeline_mode<synchronous>, transform_indices = @transform_4, window_bounds = array<i64: 32, 4>}, {pipeline_mode = #tpu.pipeline_mode<synchronous>, transform_indices = @transform_5, window_bounds = array<i64: 1, 4>}, {transform_indices = @transform_6, window_bounds = array<i64: 8, 4>}]} {
    %c0_i32 = arith.constant 0 : i32
    %0 = arith.cmpi eq, %arg1, %c0_i32 : i32
    %1 = arith.extui %0 : i1 to i32
    %c0_i32_0 = arith.constant 0 : i32
    %2 = arith.cmpi ne, %1, %c0_i32_0 : i32
    scf.if %2 {
      %cst_13 = arith.constant 0.000000e+00 : f32
      %23 = vector.broadcast %cst_13 : f32 to vector<8x128xf32>
      %c0_14 = arith.constant 0 : index
      %c0_15 = arith.constant 0 : index
      %24 = vector.load %arg9[%c0_14, %c0_15] : memref<8x128xf32, #tpu.memory_space<vmem>>, vector<8x128xf32>
      tpu.vector_store %arg9[%c0_14, %c0_15], %23 {strides = array<i32>} : memref<8x128xf32, #tpu.memory_space<vmem>>, vector<8x128xf32>,
    } else {
    }
    %c0 = arith.constant 0 : index
    %c0_1 = arith.constant 0 : index
    %c0_2 = arith.constant 0 : index
    %3 = vector.load %arg2[%c0, %c0_1, %c0_2] : memref<8x32x32xbf16, #tpu.memory_space<vmem>>, vector<8x32x32xbf16>
    %4 = vector.shape_cast %3 : vector<8x32x32xbf16> to vector<256x32xbf16>
    %c0_3 = arith.constant 0 : index
    %c0_4 = arith.constant 0 : index
    %5 = vector.load %arg3[%c0_3, %c0_4] : memref<32x128xbf16, #tpu.memory_space<vmem>>, vector<32x128xbf16>
    %cst = arith.constant dense<0.000000e+00> : vector<256x128xf32>
    %6 = tpu.matmul %4, %5, %cst {dimension_numbers = #tpu.dot_dimension_numbers<[1], [0], [0], [1], [0, 0, 1, 1], [], []>} : vector<256x32xbf16>, vector<32x128xbf16>, vector<256x128xf32> -> vector<256x128xf32>
    %cst_5 = arith.constant 0.000000e+00 : f32
    %7 = vector.broadcast %cst_5 : f32 to vector<256x128xf32>
    %8 = arith.maximumf %6, %7 : vector<256x128xf32>
    %c64_i32 = arith.constant 64 : i32
    %9 = tpu.dynamic_rotate %8 by %c64_i32 dim 1 : vector<256x128xf32>, i32 -> vector<256x128xf32>
    %10 = arith.maximumf %8, %9 : vector<256x128xf32>
    %c32_i32 = arith.constant 32 : i32
    %11 = tpu.dynamic_rotate %10 by %c32_i32 dim 1 : vector<256x128xf32>, i32 -> vector<256x128xf32>
    %12 = arith.maximumf %10, %11 : vector<256x128xf32>
    %c16_i32 = arith.constant 16 : i32
    %13 = tpu.dynamic_rotate %12 by %c16_i32 dim 1 : vector<256x128xf32>, i32 -> vector<256x128xf32>
    %14 = arith.maximumf %12, %13 : vector<256x128xf32>
    %c0_6 = arith.constant 0 : index
    %c0_7 = arith.constant 0 : index
    %15 = vector.load %arg9[%c0_6, %c0_7] : memref<8x128xf32, #tpu.memory_space<vmem>>, vector<8x128xf32>
    %16 = vector.shape_cast %14 : vector<256x128xf32> to vector<8x32x128xf32>
    %cst_8 = arith.constant dense<0.000000e+00> : vector<8x128xf32>
    %17 = vector.multi_reduction <add>, %16, %cst_8 [1] : vector<8x32x128xf32> to vector<8x128xf32>
    %18 = arith.addf %15, %17 : vector<8x128xf32>
    %c0_9 = arith.constant 0 : index
    %c0_10 = arith.constant 0 : index
    %19 = vector.load %arg9[%c0_9, %c0_10] : memref<8x128xf32, #tpu.memory_space<vmem>>, vector<8x128xf32>
    tpu.vector_store %arg9[%c0_9, %c0_10], %18 {strides = array<i32>} : memref<8x128xf32, #tpu.memory_space<vmem>>, vector<8x128xf32>,
    %c0_i32_11 = arith.constant 0 : i32
    %20 = arith.cmpi eq, %arg1, %c0_i32_11 : i32
    %21 = arith.extui %20 : i1 to i32
    %c0_i32_12 = arith.constant 0 : i32
    %22 = arith.cmpi ne, %21, %c0_i32_12 : i32
    scf.if %22 {
      %c0_13 = arith.constant 0 : index
      %c0_14 = arith.constant 0 : index
      %23 = vector.load %arg9[%c0_13, %c0_14] : memref<8x128xf32, #tpu.memory_space<vmem>>, vector<8x128xf32>
      %c0_15 = arith.constant 0 : index
      %c0_16 = arith.constant 0 : index
      %24 = vector.load %arg4[%c0_15, %c0_16] : memref<128x32xf32, #tpu.memory_space<vmem>>, vector<128x32xf32>
      %cst_17 = arith.constant dense<0.000000e+00> : vector<8x32xf32>
      %25 = tpu.matmul %23, %24, %cst_17 {dimension_numbers = #tpu.dot_dimension_numbers<[1], [0], [0], [1], [0, 0, 1, 1], [], []>} : vector<8x128xf32>, vector<128x32xf32>, vector<8x32xf32> -> vector<8x32xf32>
      %c0_18 = arith.constant 0 : index
      %c0_19 = arith.constant 0 : index
      %26 = vector.load %arg5[%c0_18, %c0_19] : memref<1x32xf32, #tpu.memory_space<vmem>>, vector<1x32xf32>
      %27 = vector.broadcast %26 : vector<1x32xf32> to vector<8x32xf32>
      %28 = arith.addf %25, %27 : vector<8x32xf32>
      %cst_20 = arith.constant 0.000000e+00 : f32
      %29 = vector.broadcast %cst_20 : f32 to vector<8x32xf32>
      %30 = arith.maximumf %28, %29 : vector<8x32xf32>
      %c0_21 = arith.constant 0 : index
      %c0_22 = arith.constant 0 : index
      %31 = vector.load %arg6[%c0_21, %c0_22] : memref<32x4xf32, #tpu.memory_space<vmem>>, vector<32x4xf32>
      %cst_23 = arith.constant dense<0.000000e+00> : vector<8x4xf32>
      %32 = tpu.matmul %30, %31, %cst_23 {dimension_numbers = #tpu.dot_dimension_numbers<[1], [0], [0], [1], [0, 0, 1, 1], [], []>} : vector<8x32xf32>, vector<32x4xf32>, vector<8x4xf32> -> vector<8x4xf32>
      %c0_24 = arith.constant 0 : index
      %c0_25 = arith.constant 0 : index
      %33 = vector.load %arg7[%c0_24, %c0_25] : memref<1x4xf32, #tpu.memory_space<vmem>>, vector<1x4xf32>
      %34 = vector.broadcast %33 : vector<1x4xf32> to vector<8x4xf32>
      %35 = arith.addf %32, %34 : vector<8x4xf32>
      %cst_26 = arith.constant dense<0xFF800000> : vector<8xf32>
      %36 = vector.multi_reduction <maximumf>, %35, %cst_26 [1] : vector<8x4xf32> to vector<8xf32>
      %37 = vector.shape_cast %36 : vector<8xf32> to vector<8x1xf32>
      %38 = vector.broadcast %37 : vector<8x1xf32> to vector<8x4xf32>
      %39 = arith.subf %35, %38 : vector<8x4xf32>
      %40 = math.exp %39 : vector<8x4xf32>
      %cst_27 = arith.constant dense<0.000000e+00> : vector<8xf32>
      %41 = vector.multi_reduction <add>, %40, %cst_27 [1] : vector<8x4xf32> to vector<8xf32>
      %42 = vector.shape_cast %41 : vector<8xf32> to vector<8x1xf32>
      %43 = math.log %42 : vector<8x1xf32>
      %44 = arith.addf %37, %43 : vector<8x1xf32>
      %45 = vector.broadcast %44 : vector<8x1xf32> to vector<8x4xf32>
      %46 = arith.subf %35, %45 : vector<8x4xf32>
      %c0_28 = arith.constant 0 : index
      %c0_29 = arith.constant 0 : index
      %47 = vector.load %arg8[%c0_28, %c0_29] : memref<8x4xf32, #tpu.memory_space<vmem>>, vector<8x4xf32>
      tpu.vector_store %arg8[%c0_28, %c0_29], %46 {strides = array<i32>} : memref<8x4xf32, #tpu.memory_space<vmem>>, vector<8x4xf32>,
    } else {
    }
    return
  }
  func.func @transform_0(%arg0: i32, %arg1: i32) -> (i32, i32, i32) {
    %c0_i32 = arith.constant 0 : i32
    %c0_i32_0 = arith.constant 0 : i32
    return %arg0, %arg1, %c0_i32 : i32, i32, i32
  }
  func.func @transform_1(%arg0: i32, %arg1: i32) -> (i32, i32) {
    %c0_i32 = arith.constant 0 : i32
    %c0_i32_0 = arith.constant 0 : i32
    %c0_i32_1 = arith.constant 0 : i32
    return %c0_i32, %c0_i32_0 : i32, i32
  }
  func.func @transform_2(%arg0: i32, %arg1: i32) -> (i32, i32) {
    %c0_i32 = arith.constant 0 : i32
    %c0_i32_0 = arith.constant 0 : i32
    %c0_i32_1 = arith.constant 0 : i32
    return %c0_i32, %c0_i32_0 : i32, i32
  }
  func.func @transform_3(%arg0: i32, %arg1: i32) -> (i32, i32) {
    %c0_i32 = arith.constant 0 : i32
    %c0_i32_0 = arith.constant 0 : i32
    %c0_i32_1 = arith.constant 0 : i32
    return %c0_i32, %c0_i32_0 : i32, i32
  }
  func.func @transform_4(%arg0: i32, %arg1: i32) -> (i32, i32) {
    %c0_i32 = arith.constant 0 : i32
    %c0_i32_0 = arith.constant 0 : i32
    %c0_i32_1 = arith.constant 0 : i32
    return %c0_i32, %c0_i32_0 : i32, i32
  }
  func.func @transform_5(%arg0: i32, %arg1: i32) -> (i32, i32) {
    %c0_i32 = arith.constant 0 : i32
    %c0_i32_0 = arith.constant 0 : i32
    %c0_i32_1 = arith.constant 0 : i32
    return %c0_i32, %c0_i32_0 : i32, i32
  }
  func.func @transform_6(%arg0: i32, %arg1: i32) -> (i32, i32) {
    %c0_i32 = arith.constant 0 : i32
    %c0_i32_0 = arith.constant 0 : i32
    return %arg0, %c0_i32 : i32, i32
  }
}

</mosaic_0001>

<bundles_post_ra>
// kernel: tpu_custom_call.1
= control target key start
LH: loop header
LB: loop body
LE: loop exit
PB: predicated region body
PF: predicated region fallthrough
CT: control target
= control target key end

     0   :  { %11 = vsyncpa [#allocation4], 0  ;;  %s2295_s0 = inlined_call_operand.hbm [shape: bf16[16,32,32], index: 0, kind: input, shape index: {}]   ;;  %s2296_s1 = inlined_call_operand.vmem [shape: bf16[32,128], index: 1, kind: input, shape index: {}]   ;;  %s2297_s2 = inlined_call_operand.vmem [shape: f32[128,32], index: 2, kind: input, shape index: {}]   ;;  %s2298_s3 = inlined_call_operand.vmem [shape: f32[1,32], index: 3, kind: input, shape index: {}]   ;;  %s2299_s4 = inlined_call_operand.vmem [shape: f32[32,4], index: 4, kind: input, shape index: {}]   ;;  %s2300_s5 = inlined_call_operand.vmem [shape: f32[1,4], index: 5, kind: input, shape index: {}]   ;;  %s2301_s6 = inlined_call_operand.vmem [shape: f32[16,4], index: 6, kind: output, shape index: {}]  }
   0x1   :  { %13 = vsyncpa [#allocation4 + $0x1], 0  ;;  %s1464_s21 = smov 0   ;;  %s1466_s22 = smov 0  }
   0x2   :  { %s1468_s23 = smov 0   ;;  %s1470_s24 = smov 0  }
   0x3   :  { %s1472_s25 = smov 0   ;;  %s1474_s26 = smov 0  }
   0x4 LB: > { %s1148_s27 = sadd.s32 4294967295, %s1422_s26   ;;  %s31_s28 = sadd.s32 1, %s1418_s25  ;;  %s1422_s26 = sphi %s1474_s26, %s19_s26   ;;  %s1418_s25 = sphi %s1472_s25, %s2325_s25   ;;  %s1414_s24 = sphi %s1470_s24, %s2324_s24   ;;  %s1410_s23 = sphi %s1468_s23, %s2323_s23   ;;  %s1406_s22 = sphi %s1466_s22, %s2322_s22   ;;  %s1402_s21 = sphi %s1464_s21, %s2321_s21  }
   0x5   : > { %p33_p0 = scmp.ge.s32.totalorder %s31_s28, 2  ;;  %s40_s29 = sadd.s32 1, %s1410_s23 }
   0x6   : > { %p47_p1 = scmp.ne.s32.totalorder %s1410_s23, %s1406_s22  ;;  %p48_p2 = scmp.eq.s32.totalorder %s1422_s26, 0 }
   0x7   : > { %s2327_s28 = smov (%p33_p0, %s31_s28), 0  ;;  %p53_p4 = scmp.ne.s32.totalorder %s1406_s22, %s1402_s21 }
   0x8   : > { %p1500_p3 = por %p48_p2, %p47_p1  ;;  %s35_s7 = ssub.s32 %s1418_s25, %s2327_s28 }
   0x9   : > { %p54_p5 = scmp.eq.s32.totalorder %s1148_s27, 0  ;;  %p38_p6 = scmp.eq.s32.totalorder %s35_s7, 0 }
   0xa   : > { %p1282_p8 = scmp.lt.s32.totalorder %s1422_s26, 2  ;;  %s223_s10 = sand.u32 1, %s1410_s23  }
   0xb   : > { %p1507_p7 = por %p54_p5, %p53_p4  ;;  %s1251_s11 = sshll.u32 %s1418_s25, 7 }
   0xc   : > { %s1513_s9 = scalar_select %p38_p6, %s1410_s23, %s40_s29  }
   0xd   : > { %s1152_s12 = sshll.u32 %s223_s10, 7  ;;  %s235_s15 = scalar_lea.hbm %s2295_s0, %s1251_s11 }
   0xe   : > { %s236_s16 = sshll.u32 %s235_s15, 4  ;;  %s227_s17 = scalar_lea.vmem [#allocation3], %s1152_s12  ;;  %s237_s16 = int_to_ptr.hbm [resolvable:$true] %s236_s16 }
   0xf   : > { %s238_s18 = sshll.u32 %s227_s17, 4  ;;  %p1279_p9 = pnand %p1282_p8, %p1500_p3  ;;  %s239_s18 = int_to_ptr.vmem [resolvable:$true] %s238_s18 }
  0x10   : > { %p1156_p10 = scmp.ge.s32.totalorder %s1422_s26, 1  ;;  %p246_p11 = scmp.lt.s32.totalorder %s1422_s26, 3 }
  0x11   : > { %s224_s19 = scalar_lea.sflag [#allocation4], %s223_s10  ;;  %s1424_s20 = smov 64  }
  0x12   : > { %s1425_s21 = smov 4   ;;  %p247_p12 = pnand %p1156_p10, %p246_p11 }
  0x13   : > { %1281 = dma.hbm_to_vmem [thread:$0]  (!%p1279_p9), %s237_s16, 2048, %s239_s18, %s224_s19, %s1424_s20, %s1424_s20, %s1425_s21  }
  0x14   : > { %250 = sbr.rel (%p247_p12) target bundleno = 1143 (0x477), region = 44 }
  0x19   : > { %s252_s27 = sand.u32 1, %s1406_s22  }
  0x1a   : > { %s1157_s29 = sshll.u32 %s252_s27, 7  ;;  %s253_s7 = scalar_lea.sflag [#allocation4], %s252_s27 }
  0x1b   : > { %s1525_s11 = scalar_lea.vmem [#allocation3], %s1157_s29 }
  0x1c   : > { %1397 = dma.done.wait (%p1507_p7), %s253_s7, 2048  }
  0x1d   : > { %1399 = vsyncadd (%p1507_p7), %s253_s7, 4294965248  ;;  %v1269_v0 = vld [vmem:[%s2296_s1 + $0x8] sm:$0xff]  ;;  %v1268_v1 = vld [vmem:[%s2296_s1] sm:$0xff]  ;;  %vm425_vm0 = vcmask 261120   ;;  %s1426_s8 = smov 64   ;;  %s1427_s14 = smov 32  }
  0x1e   : > { %480 = vmatpush.bf16.msra.mxu0 %v1269_v0  ;;  %1270 = vmatpush.bf16.msra.mxu1 %v1269_v0  ;;  %v1252_v2 = vld [vmem:[%s1525_s11] sm:$0xff]  ;;  %v1257_v3 = vld [vmem:[%s1525_s11 + $0x28] sm:$0xff]  ;;  %v1259_v4 = vld [vmem:[%s1525_s11 + $0x38] sm:$0xff]  ;;  %s1428_s15 = smov 16   ;;  %vm964_vm1 = vcmask 1041409   ;;  %vm966_vm2 = vcmask 1042434  }
  0x1f   : > { %1271 = vmatpush.bf16.msra.mxu2 %v1269_v0  ;;  %1272 = vmatpush.bf16.msra.mxu3 %v1269_v0  ;;  %v1263_v5 = vld [vmem:[%s1525_s11 + $0x58] sm:$0xff]  ;;  %v1253_v6 = vld [vmem:[%s1525_s11 + $0x8] sm:$0xff]  ;;  %v1258_v7 = vld [vmem:[%s1525_s11 + $0x30] sm:$0xff]  ;;  %vm968_vm3 = vcmask 1043459   ;;  %vm970_vm4 = vcmask 1044484   ;;  %vm972_vm5 = vcmask 1045509  }
  0x20   : > { %v1260_v8 = vld [vmem:[%s1525_s11 + $0x40] sm:$0xff]  ;;  %v1254_v10 = vld [vmem:[%s1525_s11 + $0x10] sm:$0xff]  ;;  %v1261_v11 = vld [vmem:[%s1525_s11 + $0x48] sm:$0xff]  ;;  %vm974_vm6 = vcmask 1046534   ;;  %vm976_vm7 = vcmask 1047559   ;;  %vm1057_vm8 = vcmask 31744  }
  0x21   : > { %v1264_v9 = vld [vmem:[%s1525_s11 + $0x60] sm:$0xff]  ;;  %v1265_v12 = vld [vmem:[%s1525_s11 + $0x68] sm:$0xff]  ;;  %v1255_v13 = vld [vmem:[%s1525_s11 + $0x18] sm:$0xff]  ;;  %p287_p13 = scmp.lt.s32.totalorder %s1414_s24, 1 }
  0x22   : > { %481 = vmatpush.bf16.msra.mxu0 %v1268_v1  ;;  %1273 = vmatpush.bf16.msra.mxu1 %v1268_v1  ;;  %v1262_v14 = vld [vmem:[%s1525_s11 + $0x50] sm:$0xff]  ;;  %v1256_v16 = vld [vmem:[%s1525_s11 + $0x20] sm:$0xff]  ;;  %v1267_v17 = vld [vmem:[%s1525_s11 + $0x78] sm:$0xff] }
  0x23   : > { %1274 = vmatpush.bf16.msra.mxu2 %v1268_v1  ;;  %1275 = vmatpush.bf16.msra.mxu3 %v1268_v1  ;;  %v1266_v15 = vld [vmem:[%s1525_s11 + $0x70] sm:$0xff]  ;;  %s2329_s24 = smov (!%p287_p13, %s1414_s24), 1 }
  0x24   : > { %s1158_s30 = sshll.u32 %s2329_s24, 3 }
  0x25   : > { %1231 = vmatmul.msk.bf16.vlgmr.msra.gmra.mxu0 %vm425_vm0, %v1252_v2  ;;  %1236 = vmatmul.msk.bf16.vlgmr.msra.gmra.mxu1 %vm425_vm0, %v1257_v3  ;;  %s290_s13 = scalar_lea.vmem %s2301_s6, %s1158_s30 }
  0x26   : > { %1238 = vmatmul.msk.bf16.vlgmr.msra.gmra.mxu2 %vm425_vm0, %v1259_v4  ;;  %1242 = vmatmul.msk.bf16.vlgmr.msra.gmra.mxu3 %vm425_vm0, %v1263_v5 }
  0x35   : > { %1232 = vmatmul.msk.bf16.gmra.mxu0 %vm425_vm0, %v1253_v6  ;;  %1237 = vmatmul.msk.bf16.gmra.mxu1 %vm425_vm0, %v1258_v7 }
  0x36   : > { %1239 = vmatmul.msk.bf16.gmra.mxu2 %vm425_vm0, %v1260_v8  ;;  %1243 = vmatmul.msk.bf16.gmra.mxu3 %vm425_vm0, %v1264_v9 }
  0x45   : > { %1233 = vmatmul.msk.bf16.gmra.mxu0 %vm425_vm0, %v1254_v10 }
  0x46   : > { %1240 = vmatmul.msk.bf16.gmra.mxu2 %vm425_vm0, %v1261_v11  ;;  %1244 = vmatmul.msk.bf16.gmra.mxu3 %vm425_vm0, %v1265_v12 }
  0x55   : > { %1234 = vmatmul.msk.bf16.gmra.mxu0 %vm425_vm0, %v1255_v13 }
  0x56   : > { %1241 = vmatmul.msk.bf16.gmra.mxu2 %vm425_vm0, %v1262_v14  ;;  %1245 = vmatmul.msk.bf16.gmra.mxu3 %vm425_vm0, %v1266_v15 }
  0x65   : > { %1235 = vmatmul.msk.bf16.gmra.mxu0 %vm425_vm0, %v1256_v16 }
  0x66   : > { %1246 = vmatmul.msk.bf16.gmra.mxu3 %vm425_vm0, %v1267_v17 }
  0xa2   : > { %v1569_v18 = vpop.f32.mrf.mxu0  ;;  %v1571_v19 = vpop.f32.mrf.mxu1 }
  0xa3   : > { %v563_v20 = vmax.f32 %v1569_v18, 0.0  ;;  %v573_v21 = vmax.f32 %v1571_v19, 0.0 }
  0xa5   : > { %615 = vrot.lane.b32.xlu1 %v573_v21, %s1426_s8  ;;  %595 = vrot.lane.b32.xlu0 %v563_v20, %s1426_s8 }
  0xa9   : > { %v1581_v22 = vpop.f32.mrf.mxu2  ;;  %v1583_v23 = vpop.f32.mrf.mxu3 }
  0xaa   : > { %v585_v24 = vmax.f32 %v1583_v23, 0.0  ;;  %v1586_v25 = vpop.f32.mrf.mxu0  ;;  %v1588_v26 = vpop.f32.mrf.mxu1  ;;  %v577_v27 = vmax.f32 %v1581_v22, 0.0 }
  0xab   : > { %v564_v33 = vmax.f32 %v1586_v25, 0.0  ;;  %v574_v40 = vmax.f32 %v1588_v26, 0.0 }
  0xac   : > { %639 = vrot.lane.b32.xlu2 %v585_v24, %s1426_s8 }
  0xad   : > { %623 = vrot.lane.b32.xlu0 %v577_v27, %s1426_s8 }
  0xb1   : > { %v1597_v28 = vpop.f32.mrf.mxu2  ;;  %v1599_v29 = vpop.f32.mrf.mxu3 }
  0xb2   : > { %v578_v30 = vmax.f32 %v1597_v28, 0.0  ;;  %v1602_v31 = vpop.f32.mrf.mxu0  ;;  %v1604_v32 = vpop.f32.mrf.mxu1  ;;  %v586_v37 = vmax.f32 %v1599_v29, 0.0 }
  0xb3   : > { %v575_v34 = vmax.f32 %v1604_v32, 0.0  ;;  %v565_v46 = vmax.f32 %v1602_v31, 0.0 }
  0xb4   : > { %625 = vrot.lane.b32.xlu1 %v578_v30, %s1426_s8 }
  0xb5   : > { %619 = vrot.lane.b32.xlu2 %v575_v34, %s1426_s8  ;;  %597 = vrot.lane.b32.xlu0 %v564_v33, %s1426_s8 }
  0xb9   : > { %v1617_v35 = vpop.f32.mrf.mxu2  ;;  %v1619_v36 = vpop.f32.mrf.mxu3 }
  0xba   : > { %v579_v38 = vmax.f32 %v1617_v35, 0.0  ;;  %v1623_v39 = vpop.f32.mrf.mxu0  ;;  %v587_v42 = vmax.f32 %v1619_v36, 0.0  ;;  %v1654_v48 = vpop.f32.mrf.mxu1 }
  0xbb   : > { %v566_v44 = vmax.f32 %v1623_v39, 0.0  ;;  %v576_v52 = vmax.f32 %v1654_v48, 0.0 }
  0xbc   : > { %641 = vrot.lane.b32.xlu1 %v586_v37, %s1426_s8 }
  0xbd   : > { %627 = vrot.lane.b32.xlu2 %v579_v38, %s1426_s8  ;;  %617 = vrot.lane.b32.xlu0 %v574_v40, %s1426_s8 }
  0xc1   : > { %v1635_v41 = vpop.f32.mrf.mxu2  ;;  %v1638_v43 = vpop.f32.mrf.mxu3 }
  0xc2   : > { %v1641_v45 = vpop.f32.mrf.mxu0  ;;  %v580_v58 = vmax.f32 %v1635_v41, 0.0  ;;  %v588_v63 = vmax.f32 %v1638_v43, 0.0 }
  0xc3   : > { %v567_v47 = vmax.f32 %v1641_v45, 0.0 }
  0xc4   : > { %601 = vrot.lane.b32.xlu1 %v566_v44, %s1426_s8 }
  0xc5   : > { %643 = vrot.lane.b32.xlu2 %v587_v42, %s1426_s8  ;;  %599 = vrot.lane.b32.xlu0 %v565_v46, %s1426_s8 }
  0xc9   : > { %v1656_v49 = vpop.f32.mrf.mxu2  ;;  %v1658_v50 = vpop.f32.mrf.mxu3 }
  0xca   : > { %v1660_v51 = vpop.f32.mrf.mxu0  ;;  %v581_v53 = vmax.f32 %v1656_v49, 0.0  ;;  %v589_v5 = vmax.f32 %v1658_v50, 0.0 }
  0xcb   : > { %v2307_v61 = vmax.f32 %v1660_v51, 0.0 }
  0xcc   : > { %603 = vrot.lane.b32.xlu1 %v567_v47, %s1426_s8 }
  0xcd   : > { %621 = vrot.lane.b32.xlu0 %v576_v52, %s1426_s8 }
  0xd1   : > { %v1670_v54 = vpop.f32.mrf.mxu2  ;;  %v1672_v55 = vpop.f32.mrf.mxu3 }
  0xd2   : > { %v582_v56 = vmax.f32 %v1670_v54, 0.0  ;;  %v1675_v57 = vpop.f32.mrf.mxu0  ;;  %v2304_v9 = vmax.f32 %v1672_v55, 0.0 }
  0xd3   : > { %v569_v1 = vmax.f32 %v1675_v57, 0.0 }
  0xd4   : > { %633 = vrot.lane.b32.xlu2 %v582_v56, %s1426_s8  ;;  %631 = vrot.lane.b32.xlu1 %v581_v53, %s1426_s8 }
  0xd5   : > { %629 = vrot.lane.b32.xlu0 %v580_v58, %s1426_s8 }
  0xd9   : > { %v1687_v59 = vpop.f32.mrf.mxu2  ;;  %v1689_v60 = vpop.f32.mrf.mxu3 }
  0xda   : > { %v1692_v62 = vpop.f32.mrf.mxu0  ;;  %v583_v7 = vmax.f32 %v1687_v59, 0.0  ;;  %v2302_v13 = vmax.f32 %v1689_v60, 0.0 }
  0xdb   : > { %v570_v0 = vmax.f32 %v1692_v62, 0.0 }
  0xdc   : > { %605 = vrot.lane.b32.xlu1 %v2307_v61, %s1426_s8 }
  0xdd   : > { %645 = vrot.lane.b32.xlu0 %v588_v63, %s1426_s8  ;;  %609 = vrot.lane.b32.xlu2 %v570_v0, %s1426_s8 }
  0xe1   : > { %v1706_v2 = vpop.f32.mrf.mxu2  ;;  %v1708_v3 = vpop.f32.mrf.mxu3 }
  0xe2   : > { %v584_v4 = vmax.f32 %v1706_v2, 0.0  ;;  %v1721_v6 = vpop.f32.mrf.mxu0  ;;  %v2305_v11 = vmax.f32 %v1708_v3, 0.0 }
  0xe3   : > { %v2303_v8 = vmax.f32 %v1721_v6, 0.0 }
  0xe4   : > { %607 = vrot.lane.b32.xlu1 %v569_v1, %s1426_s8 }
  0xe5   : > { %647 = vrot.lane.b32.xlu0 %v589_v5, %s1426_s8  ;;  %637 = vrot.lane.b32.xlu2 %v584_v4, %s1426_s8 }
  0xe9   : > { %v1726_v10 = vpop.f32.mrf.mxu3 }
  0xea   : > { %v593_v12 = vmax.f32 %v1726_v10, 0.0  ;;  %v1751_v15 = vpop.f32.mrf.mxu0 }
  0xeb   : > { %v2308_v17 = vmax.f32 %v1751_v15, 0.0  ;;  %v2313_v59 = vmax.f32 %v1751_v15, 0.0 }
  0xec   : > { %635 = vrot.lane.b32.xlu1 %v583_v7, %s1426_s8 }
  0xed   : > { %649 = vrot.lane.b32.xlu0 %v2304_v9, %s1426_s8  ;;  %611 = vrot.lane.b32.xlu2 %v2303_v8, %s1426_s8 }
  0xf1   : > { %v1749_v14 = vpop.f32.mrf.mxu3 }
  0xf2   : > { %v2306_v16 = vmax.f32 %v1749_v14, 0.0 }
  0xf4   : > { %653 = vrot.lane.b32.xlu1 %v2305_v11, %s1426_s8 }
  0xf5   : > { %651 = vrot.lane.b32.xlu0 %v2302_v13, %s1426_s8  ;;  %655 = vrot.lane.b32.xlu2 %v593_v12, %s1426_s8 }
  0xfc   : > { %657 = vrot.lane.b32.xlu1 %v2306_v16, %s1426_s8 }
  0xfd   : > { %613 = vrot.lane.b32.xlu2 %v2308_v17, %s1426_s8 }
 0x106   : > { %v640_v13 = vpop.permute.xlu2 %639 }
 0x107   : > { %v1763_v8 = vmax.f32 %v585_v24, %v640_v13 }
 0x109   : > { %735 = vrot.lane.b32.xlu1 %v1763_v8, %s1427_s14 }
 0x10f   : > { %v620_v9 = vpop.permute.xlu2 %619 }
 0x110   : > { %v1769_v11 = vmax.f32 %v575_v34, %v620_v9 }
 0x112   : > { %715 = vrot.lane.b32.xlu1 %v1769_v11, %s1427_s14 }
 0x117   : > { %v616_v16 = vpop.permute.xlu1 %615  ;;  %v628_v61 = vpop.permute.xlu2 %627 }
 0x118   : > { %v1775_v17 = vmax.f32 %v573_v21, %v616_v16  ;;  %v1779_v23 = vmax.f32 %v579_v38, %v628_v61  ;;  %v596_v24 = vpop.permute.xlu0 %595  ;;  %v2315_v16 = vmax.f32 %v1672_v55, 0.0 }
 0x119   : > { %v1783_v13 = vmax.f32 %v563_v20, %v596_v24 }
 0x11a   : > { %711 = vrot.lane.b32.xlu0 %v1775_v17, %s1427_s14  ;;  %723 = vrot.lane.b32.xlu1 %v1779_v23, %s1427_s14 }
 0x11b   : > { %691 = vrot.lane.b32.xlu2 %v1783_v13, %s1427_s14 }
 0x11f   : > { %v644_v19 = vpop.permute.xlu2 %643 }
 0x120   : > { %v1793_v21 = vmax.f32 %v587_v42, %v644_v19  ;;  %v624_v32 = vpop.permute.xlu0 %623  ;;  %v2316_v19 = vmax.f32 %v1721_v6, 0.0 }
 0x121   : > { %v1797_v18 = vmax.f32 %v577_v27, %v624_v32 }
 0x122   : > { %739 = vrot.lane.b32.xlu1 %v1793_v21, %s1427_s14 }
 0x123   : > { %719 = vrot.lane.b32.xlu2 %v1797_v18, %s1427_s14 }
 0x126   : > { %v626_v20 = vpop.permute.xlu1 %625 }
 0x127   : > { %v1811_v22 = vmax.f32 %v578_v30, %v626_v20 }
 0x128   : > { %v598_v34 = vpop.permute.xlu0 %597 }
 0x129   : > { %v1805_v35 = vmax.f32 %v564_v33, %v598_v34 }
 0x12b   : > { %693 = vrot.lane.b32.xlu0 %v1805_v35, %s1427_s14 }
 0x12e   : > { %v642_v36 = vpop.permute.xlu1 %641  ;;  %v634_v25 = vpop.permute.xlu2 %633 }
 0x12f   : > { %v1823_v61 = vmax.f32 %v586_v37, %v642_v36  ;;  %v1853_v39 = vmax.f32 %v582_v56, %v634_v25 }
 0x130   : > { %v618_v38 = vpop.permute.xlu0 %617 }
 0x131   : > { %v1815_v27 = vmax.f32 %v574_v40, %v618_v38  ;;  %v2318_v38 = vmax.f32 %v1749_v14, 0.0 }
 0x133   : > { %721 = vrot.lane.b32.xlu0 %v1811_v22, %s1427_s14  ;;  %713 = vrot.lane.b32.xlu2 %v1815_v27, %s1427_s14 }
 0x136   : > { %v602_v33 = vpop.permute.xlu1 %601 }
 0x137   : > { %v610_v26 = vpop.permute.xlu2 %609  ;;  %v1839_v29 = vmax.f32 %v566_v44, %v602_v33 }
 0x138   : > { %v600_v42 = vpop.permute.xlu0 %599 }
 0x139   : > { %v1827_v28 = vmax.f32 %v565_v46, %v600_v42 }
 0x13b   : > { %737 = vrot.lane.b32.xlu0 %v1823_v61, %s1427_s14  ;;  %695 = vrot.lane.b32.xlu2 %v1827_v28, %s1427_s14 }
 0x13e   : > { %v604_v30 = vpop.permute.xlu1 %603 }
 0x13f   : > { %v1835_v40 = vmax.f32 %v567_v47, %v604_v30  ;;  %v638_v37 = vpop.permute.xlu2 %637 }
 0x140   : > { %v622_v9 = vpop.permute.xlu0 %621  ;;  %v1883_v56 = vmax.f32 %v584_v4, %v638_v37 }
 0x141   : > { %v1843_v31 = vmax.f32 %v576_v52, %v622_v9  ;;  %699 = vrot.lane.b32.xlu1 %v1835_v40, %s1427_s14  ;;  %v1871_v52 = vmax.f32 %v570_v0, %v610_v26 }
 0x143   : > { %697 = vrot.lane.b32.xlu0 %v1839_v29, %s1427_s14  ;;  %717 = vrot.lane.b32.xlu2 %v1843_v31, %s1427_s14 }
 0x146   : > { %v632_v45 = vpop.permute.xlu1 %631 }
 0x147   : > { %v1857_v46 = vmax.f32 %v581_v53, %v632_v45  ;;  %v612_v49 = vpop.permute.xlu2 %611 }
 0x148   : > { %v630_v44 = vpop.permute.xlu0 %629  ;;  %v1937_v32 = vmax.f32 %v2316_v19, %v612_v49 }
 0x149   : > { %v1861_v47 = vmax.f32 %v580_v58, %v630_v44  ;;  %729 = vrot.lane.b32.xlu1 %v1853_v39, %s1427_s14 }
 0x14b   : > { %727 = vrot.lane.b32.xlu0 %v1857_v46, %s1427_s14  ;;  %725 = vrot.lane.b32.xlu2 %v1861_v47, %s1427_s14 }
 0x14e   : > { %v606_v48 = vpop.permute.xlu1 %605 }
 0x150   : > { %v646_v53 = vpop.permute.xlu0 %645 }
 0x151   : > { %v1875_v41 = vmax.f32 %v588_v63, %v646_v53  ;;  %705 = vrot.lane.b32.xlu1 %v1871_v52, %s1427_s14  ;;  %v656_v63 = vpop.permute.xlu2 %655 }
 0x152   : > { %v1901_v57 = vmax.f32 %v593_v12, %v656_v63 }
 0x153   : > { %741 = vrot.lane.b32.xlu2 %v1875_v41, %s1427_s14 }
 0x156   : > { %v608_v54 = vpop.permute.xlu1 %607 }
 0x157   : > { %v1887_v58 = vmax.f32 %v569_v1, %v608_v54  ;;  %v2312_v1 = vmax.f32 %v1660_v51, 0.0  ;;  %v2314_v51 = vmax.f32 %v1708_v3, 0.0  ;;  %v2317_v3 = vmax.f32 %v1689_v60, 0.0 }
 0x158   : > { %v648_v62 = vpop.permute.xlu0 %647 }
 0x159   : > { %v1891_v43 = vmax.f32 %v589_v5, %v648_v62  ;;  %703 = vrot.lane.b32.xlu0 %v1887_v58, %s1427_s14  ;;  %733 = vrot.lane.b32.xlu1 %v1883_v56, %s1427_s14  ;;  %v1909_v2 = vmax.f32 %v2312_v1, %v606_v48  ;;  %v614_v4 = vpop.permute.xlu2 %613 }
 0x15b   : > { %743 = vrot.lane.b32.xlu2 %v1891_v43, %s1427_s14 }
 0x15e   : > { %v636_v0 = vpop.permute.xlu1 %635 }
 0x15f   : > { %v1905_v50 = vmax.f32 %v583_v7, %v636_v0  ;;  %v1919_v7 = vmax.f32 %v2313_v59, %v614_v4 }
 0x160   : > { %v650_v5 = vpop.permute.xlu0 %649 }
 0x161   : > { %731 = vrot.lane.b32.xlu0 %v1905_v50, %s1427_s14  ;;  %751 = vrot.lane.b32.xlu1 %v1901_v57, %s1427_s14  ;;  %v1927_v24 = vmax.f32 %v2315_v16, %v650_v5 }
 0x163   : > { %701 = vrot.lane.b32.xlu2 %v1909_v2, %s1427_s14 }
 0x166   : > { %v654_v10 = vpop.permute.xlu1 %653 }
 0x167   : > { %v1923_v12 = vmax.f32 %v2314_v51, %v654_v10 }
 0x168   : > { %v652_v15 = vpop.permute.xlu0 %651 }
 0x169   : > { %749 = vrot.lane.b32.xlu0 %v1923_v12, %s1427_s14  ;;  %709 = vrot.lane.b32.xlu1 %v1919_v7, %s1427_s14  ;;  %v1941_v20 = vmax.f32 %v2317_v3, %v652_v15 }
 0x16b   : > { %745 = vrot.lane.b32.xlu2 %v1927_v24, %s1427_s14 }
 0x16e   : > { %v658_v55 = vpop.permute.xlu1 %657 }
 0x16f   : > { %v1952_v6 = vmax.f32 %v2318_v38, %v658_v55 }
 0x171   : > { %707 = vrot.lane.b32.xlu0 %v1937_v32, %s1427_s14 }
 0x173   : > { %747 = vrot.lane.b32.xlu2 %v1941_v20, %s1427_s14 }
 0x175   : > { %v692_v34 = vpop.permute.xlu2 %691 }
 0x176   : > { %v1948_v36 = vmax.f32 %v1783_v13, %v692_v34 }
 0x178   : > { %787 = vrot.lane.b32.xlu1 %v1948_v36, %s1428_s15 }
 0x179   : > { %753 = vrot.lane.b32.xlu0 %v1952_v6, %s1427_s14 }
 0x17b   : > { %v736_v60 = vpop.permute.xlu1 %735 }
 0x17c   : > { %v1962_v42 = vmax.f32 %v1763_v8, %v736_v60 }
 0x17d   : > { %v720_v25 = vpop.permute.xlu2 %719 }
 0x17e   : > { %v1959_v33 = vmax.f32 %v1797_v18, %v720_v25 }
 0x180   : > { %815 = vrot.lane.b32.xlu1 %v1959_v33, %s1428_s15 }
 0x181   : > { %831 = vrot.lane.b32.xlu0 %v1962_v42, %s1428_s15 }
 0x184   : > { %v716_v14 = vpop.permute.xlu1 %715 }
 0x185   : > { %v1969_v13 = vmax.f32 %v1769_v11, %v716_v14 }
 0x189   : > { %811 = vrot.lane.b32.xlu0 %v1969_v13, %s1428_s15 }
 0x18c   : > { %v712_v26 = vpop.permute.xlu0 %711  ;;  %v724_v30 = vpop.permute.xlu1 %723 }
 0x18d   : > { %v1974_v18 = vmax.f32 %v1775_v17, %v712_v26  ;;  %v1977_v8 = vmax.f32 %v1779_v23, %v724_v30  ;;  %v714_v9 = vpop.permute.xlu2 %713 }
 0x18e   : > { %v1980_v37 = vmax.f32 %v1815_v27, %v714_v9 }
 0x18f   : > { %807 = vrot.lane.b32.xlu2 %v1974_v18, %s1428_s15 }
 0x190   : > { %809 = vrot.lane.b32.xlu1 %v1980_v37, %s1428_s15 }
 0x191   : > { %819 = vrot.lane.b32.xlu0 %v1977_v8, %s1428_s15 }
 0x194   : > { %v740_v11 = vpop.permute.xlu1 %739 }
 0x195   : > { %v1989_v17 = vmax.f32 %v1793_v21, %v740_v11  ;;  %v696_v45 = vpop.permute.xlu2 %695 }
 0x196   : > { %v1992_v23 = vmax.f32 %v1827_v28, %v696_v45 }
 0x198   : > { %791 = vrot.lane.b32.xlu1 %v1992_v23, %s1428_s15 }
 0x199   : > { %835 = vrot.lane.b32.xlu0 %v1989_v17, %s1428_s15 }
 0x19d   : > { %v694_v27 = vpop.permute.xlu0 %693  ;;  %v718_v44 = vpop.permute.xlu2 %717 }
 0x19e   : > { %v1999_v48 = vmax.f32 %v1805_v35, %v694_v27  ;;  %v2002_v49 = vmax.f32 %v1843_v31, %v718_v44 }
 0x1a0   : > { %789 = vrot.lane.b32.xlu2 %v1999_v48, %s1428_s15  ;;  %813 = vrot.lane.b32.xlu1 %v2002_v49, %s1428_s15 }
 0x1a5   : > { %v722_v21 = vpop.permute.xlu0 %721  ;;  %v726_v28 = vpop.permute.xlu2 %725 }
 0x1a6   : > { %v2009_v53 = vmax.f32 %v1811_v22, %v722_v21  ;;  %v2012_v54 = vmax.f32 %v1861_v47, %v726_v28 }
 0x1a8   : > { %817 = vrot.lane.b32.xlu2 %v2009_v53, %s1428_s15  ;;  %821 = vrot.lane.b32.xlu1 %v2012_v54, %s1428_s15 }
 0x1ad   : > { %v738_v35 = vpop.permute.xlu0 %737  ;;  %v742_v31 = vpop.permute.xlu2 %741 }
 0x1ae   : > { %v2019_v62 = vmax.f32 %v1875_v41, %v742_v31 }
 0x1b0   : > { %837 = vrot.lane.b32.xlu1 %v2019_v62, %s1428_s15 }
 0x1b3   : > { %v700_v63 = vpop.permute.xlu1 %699 }
 0x1b4   : > { %v2024_v22 = vmax.f32 %v1835_v40, %v700_v63 }
 0x1b5   : > { %v698_v47 = vpop.permute.xlu0 %697  ;;  %v744_v0 = vpop.permute.xlu2 %743 }
 0x1b6   : > { %v2027_v1 = vmax.f32 %v1839_v29, %v698_v47  ;;  %v2030_v4 = vmax.f32 %v1891_v43, %v744_v0  ;;  %795 = vrot.lane.b32.xlu0 %v2024_v22, %s1428_s15 }
 0x1b8   : > { %793 = vrot.lane.b32.xlu2 %v2027_v1, %s1428_s15  ;;  %839 = vrot.lane.b32.xlu1 %v2030_v4, %s1428_s15 }
 0x1bb   : > { %v730_v41 = vpop.permute.xlu1 %729 }
 0x1bc   : > { %v2039_v40 = vmax.f32 %v1853_v39, %v730_v41  ;;  %v1000_v41 = vld [vmem:[%s2297_s2 + $0x78] sm:$0xff] }
 0x1bd   : > { %v728_v5 = vpop.permute.xlu0 %727  ;;  %v702_v10 = vpop.permute.xlu2 %701  ;;  %1005 = vmatpush.msrb.mxu1 %v1000_v41  ;;  %v992_v41 = vld [vmem:[%s2297_s2 + $0x38] sm:$0xff] }
 0x1be   : > { %v2042_v29 = vmax.f32 %v1857_v46, %v728_v5  ;;  %v2045_v43 = vmax.f32 %v1909_v2, %v702_v10  ;;  %825 = vrot.lane.b32.xlu0 %v2039_v40, %s1428_s15  ;;  %v999_v5 = vld [vmem:[%s2297_s2 + $0x70] sm:$0xff] }
 0x1bf   : > { %1006 = vmatpush.msrb.mxu1 %v999_v5 }
 0x1c0   : > { %823 = vrot.lane.b32.xlu2 %v2042_v29, %s1428_s15  ;;  %797 = vrot.lane.b32.xlu1 %v2045_v43, %s1428_s15 }
 0x1c3   : > { %v706_v59 = vpop.permute.xlu1 %705 }
 0x1c4   : > { %v2054_v39 = vmax.f32 %v1871_v52, %v706_v59 }
 0x1c5   : > { %v746_v51 = vpop.permute.xlu2 %745 }
 0x1c6   : > { %801 = vrot.lane.b32.xlu0 %v2054_v39, %s1428_s15 }
 0x1cb   : > { %v704_v46 = vpop.permute.xlu0 %703  ;;  %v734_v2 = vpop.permute.xlu1 %733 }
 0x1cc   : > { %v2059_v16 = vmax.f32 %v1887_v58, %v704_v46  ;;  %v2062_v15 = vmax.f32 %v1883_v56, %v734_v2  ;;  %v2077_v56 = vmax.f32 %v1927_v24, %v746_v51  ;;  %v998_v46 = vld [vmem:[%s2297_s2 + $0x68] sm:$0xff]  ;;  %v997_v2 = vld [vmem:[%s2297_s2 + $0x60] sm:$0xff] }
 0x1cd   : > { %v748_v19 = vpop.permute.xlu2 %747  ;;  %1007 = vmatpush.msrb.mxu1 %v998_v46  ;;  %v991_v46 = vld [vmem:[%s2297_s2 + $0x30] sm:$0xff] }
 0x1ce   : > { %v2065_v3 = vmax.f32 %v1941_v20, %v748_v19  ;;  %829 = vrot.lane.b32.xlu0 %v2062_v15, %s1428_s15  ;;  %799 = vrot.lane.b32.xlu2 %v2059_v16, %s1428_s15  ;;  %v996_v19 = vld [vmem:[%s2297_s2 + $0x58] sm:$0xff] }
 0x1cf   : > { %1008 = vmatpush.msrb.mxu1 %v997_v2 }
 0x1d0   : > { %843 = vrot.lane.b32.xlu1 %v2065_v3, %s1428_s15 }
 0x1d1   : > { %1009 = vmatpush.msrb.mxu1 %v996_v19 }
 0x1d3   : > { %v732_v52 = vpop.permute.xlu0 %731  ;;  %v752_v55 = vpop.permute.xlu1 %751 }
 0x1d4   : > { %v2074_v58 = vmax.f32 %v1905_v50, %v732_v52  ;;  %v2094_v24 = vmax.f32 %v1901_v57, %v752_v55  ;;  %v995_v52 = vld [vmem:[%s2297_s2 + $0x50] sm:$0xff] }
 0x1d5   : > { %1010 = vmatpush.msrb.mxu1 %v995_v52 }
 0x1d6   : > { %827 = vrot.lane.b32.xlu2 %v2074_v58, %s1428_s15 }
 0x1d8   : > { %841 = vrot.lane.b32.xlu1 %v2077_v56, %s1428_s15 }
 0x1db   : > { %v750_v20 = vpop.permute.xlu0 %749  ;;  %v710_v34 = vpop.permute.xlu1 %709 }
 0x1dc   : > { %v2084_v38 = vmax.f32 %v1923_v12, %v750_v20  ;;  %v2087_v60 = vmax.f32 %v1919_v7, %v710_v34  ;;  %v2104_v7 = vmax.f32 %v1823_v61, %v738_v35  ;;  %v994_v34 = vld [vmem:[%s2297_s2 + $0x48] sm:$0xff] }
 0x1dd   : > { %1011 = vmatpush.msrb.mxu1 %v994_v34  ;;  %v990_v34 = vld [vmem:[%s2297_s2 + $0x28] sm:$0xff] }
 0x1de   : > { %845 = vrot.lane.b32.xlu2 %v2084_v38, %s1428_s15  ;;  %805 = vrot.lane.b32.xlu0 %v2087_v60, %s1428_s15 }
 0x1e3   : > { %v708_v50 = vpop.permute.xlu0 %707 }
 0x1e4   : > { %v2097_v25 = vmax.f32 %v1937_v32, %v708_v50 }
 0x1e6   : > { %803 = vrot.lane.b32.xlu2 %v2097_v25, %s1428_s15  ;;  %847 = vrot.lane.b32.xlu0 %v2094_v24, %s1428_s15 }
 0x1e9   : > { %v2117_v26 = vpop.permute.xlu2 %807 }
 0x1ea   : > { %v2108_v12 = vpop.permute.xlu1 %787 }
 0x1eb   : > { %v754_v14 = vpop.permute.xlu0 %753 }
 0x1ec   : > { %v2111_v57 = vmax.f32 %v1952_v6, %v754_v14  ;;  %v993_v14 = vld [vmem:[%s2297_s2 + $0x40] sm:$0xff] }
 0x1ed   : > { %1012 = vmatpush.msrb.mxu1 %v993_v14 }
 0x1ee   : > { %833 = vrot.lane.b32.xlu2 %v2104_v7, %s1428_s15  ;;  %2319 = vst [vmem:[#allocation6_spill] sm:$0xff] %v2111_v57 }
 0x1ef   : > { %1013 = vmatpush.msrb.mxu1 %v992_v41 }
 0x1f1   : > { %1014 = vmatpush.msrb.mxu1 %v991_v46 }
 0x1f2   : > { %v2115_v32 = vpop.permute.xlu1 %815 }
 0x1f3   : > { %v2119_v30 = vpop.permute.xlu0 %831  ;;  %1015 = vmatpush.msrb.mxu1 %v990_v34 }
 0x1f6   : > { %849 = vrot.lane.b32.xlu2 %v2111_v57, %s1428_s15 }
 0x1fa   : > { %v2123_v9 = vpop.permute.xlu2 %789 }
 0x1fb   : > { %v812_v45 = vpop.permute.xlu0 %811 }
 0x202   : > { %v2121_v61 = vpop.permute.xlu1 %809  ;;  %v2127_v27 = vpop.permute.xlu2 %817 }
 0x203   : > { %v2129_v44 = vpop.permute.xlu0 %819  ;;  %v866_v46 = vmax.f32 %v2009_v53, %v2127_v27 }
 0x20a   : > { %v2125_v11 = vpop.permute.xlu1 %791 }
 0x20b   : > { %v2135_v35 = vpop.permute.xlu0 %835 }
 0x212   : > { %v814_v6 = vpop.permute.xlu1 %813  ;;  %v2131_v21 = vpop.permute.xlu2 %793 }
 0x213   : > { %v864_v2 = vmax.f32 %v2002_v49, %v814_v6  ;;  %v989_v49 = vld [vmem:[%s2297_s2 + $0x20] sm:$0xff]  ;;  %v853_v6 = vmax.f32 %v1992_v23, %v2125_v11  ;;  %v865_v23 = vmax.f32 %v1959_v33, %v2115_v32  ;;  %v854_v11 = vmax.f32 %v2027_v1, %v2131_v21 }
 0x214   : > { %1016 = vmatpush.msrb.mxu1 %v989_v49  ;;  %v985_v1 = vld [vmem:[%s2297_s2] sm:$0xff] }
 0x21a   : > { %v2133_v28 = vpop.permute.xlu1 %821  ;;  %v2137_v31 = vpop.permute.xlu2 %823 }
 0x21b   : > { %v869_v21 = vmax.f32 %v2042_v29, %v2137_v31 }
 0x222   : > { %v2139_v63 = vpop.permute.xlu1 %837 }
 0x228   : > { %v796_v47 = vpop.permute.xlu0 %795  ;;  %v800_v0 = vpop.permute.xlu2 %799 }
 0x229   : > { %v855_v19 = vmax.f32 %v2024_v22, %v796_v47  ;;  %v851_v22 = vmax.f32 %v1948_v36, %v2108_v12  ;;  %v868_v47 = vmax.f32 %v2012_v54, %v2133_v28  ;;  %v987_v36 = vld [vmem:[%s2297_s2 + $0x10] sm:$0xff]  ;;  %v867_v54 = vmax.f32 %v1977_v8, %v2129_v44 }
 0x22a   : > { %v2147_v10 = vpop.permute.xlu1 %839 }
 0x22b   : > { %v920_v28 = vadd.f32 %v868_v47, %v867_v54 }
 0x230   : > { %v2149_v59 = vpop.permute.xlu0 %825  ;;  %v828_v51 = vpop.permute.xlu2 %827 }
 0x232   : > { %v798_v50 = vpop.permute.xlu1 %797 }
 0x233   : > { %v856_v5 = vmax.f32 %v2045_v43, %v798_v50  ;;  %v852_v43 = vmax.f32 %v1999_v48, %v2123_v9  ;;  %v863_v50 = vmax.f32 %v1969_v13, %v812_v45  ;;  %v988_v13 = vld [vmem:[%s2297_s2 + $0x18] sm:$0xff]  ;;  %v857_v9 = vmax.f32 %v2059_v16, %v800_v0 }
 0x234   : > { %1017 = vmatpush.msrb.mxu1 %v988_v13  ;;  %v871_v16 = vmax.f32 %v2074_v58, %v828_v51  ;;  %v876_v0 = vmax.f32 %v2019_v62, %v2139_v63  ;;  %v875_v58 = vmax.f32 %v1989_v17, %v2135_v35  ;;  %v877_v51 = vmax.f32 %v2030_v4, %v2147_v10 }
 0x235   : > { %v893_v41 = vadd.f32 %v856_v5, %v855_v19  ;;  %v911_v48 = vadd.f32 %v864_v2, %v863_v50  ;;  %v884_v12 = vadd.f32 %v852_v43, %v851_v22  ;;  %v870_v62 = vmax.f32 %v2039_v40, %v2149_v59  ;;  %v1029_v40 = vld [vmem:[%s2299_s4 + $0x18] sm:$0xff] }
 0x236   : > { %1018 = vmatpush.msrb.mxu1 %v987_v36  ;;  %v873_v63 = vmax.f32 %v1962_v42, %v2119_v30  ;;  %v921_v35 = vadd.f32 %v920_v28, %v869_v21  ;;  %v938_v34 = vadd.f32 %v876_v0, %v875_v58  ;;  %v1028_v42 = vld [vmem:[%s2299_s4 + $0x10] sm:$0xff]  ;;  %1049 = vmatpush.msrb.mxu2 %v1029_v40 }
 0x237   : > { %v885_v33 = vadd.f32 %v884_v12, %v853_v6  ;;  %v912_v32 = vadd.f32 %v911_v48, %v865_v23  ;;  %v861_v48 = vmax.f32 %v1974_v18, %v2117_v26  ;;  %v862_v23 = vmax.f32 %v1980_v37, %v2121_v61 }
 0x238   : > { %v802_v55 = vpop.permute.xlu0 %801  ;;  %v2163_v20 = vpop.permute.xlu2 %845  ;;  %v939_v53 = vadd.f32 %v938_v34, %v877_v51  ;;  %v922_v30 = vadd.f32 %v921_v35, %v870_v62  ;;  %1050 = vmatpush.msrb.mxu2 %v1028_v42 }
 0x239   : > { %v858_v45 = vmax.f32 %v2054_v39, %v802_v55  ;;  %v894_v39 = vadd.f32 %v893_v41, %v857_v9  ;;  %v886_v2 = vadd.f32 %v885_v33, %v854_v11  ;;  %v913_v4 = vadd.f32 %v912_v32, %v866_v46  ;;  %v1026_v41 = vld [vmem:[%s2299_s4] sm:$0xff] }
 0x23a   : > { %v923_v49 = vrot.slane %v922_v30, 4  ;;  %v880_v11 = vmax.f32 %v2084_v38, %v2163_v20 }
 0x23b   : > { %v895_v8 = vadd.f32 %v894_v39, %v858_v45 }
 0x23c   : > { %v924_v54 = vadd.f32 %v923_v49, %v922_v30 }
 0x23d   : > { %v896_v31 = vrot.slane %v895_v8, 4 }
 0x23e   : > { %v925_v0 = vrot.slane %v924_v54, 2 }
 0x23f   : > { %v897_v43 = vadd.f32 %v896_v31, %v895_v8 }
 0x240   : > { %v2180_v52 = vpop.permute.xlu2 %803  ;;  %v830_v14 = vpop.permute.xlu0 %829  ;;  %v926_v20 = vadd.f32 %v925_v0, %v924_v54 }
 0x241   : > { %v872_v5 = vmax.f32 %v2062_v15, %v830_v14  ;;  %v986_v15 = vld [vmem:[%s2297_s2 + $0x8] sm:$0xff]  ;;  %v914_v14 = vrot.slane %v913_v4, 4  ;;  %v859_v22 = vmax.f32 %v2097_v25, %v2180_v52  ;;  %v898_v36 = vrot.slane %v897_v43, 2 }
 0x242   : > { %v2188_v57 = vpop.permute.xlu1 %843  ;;  %1019 = vmatpush.msrb.mxu1 %v986_v15 }
 0x243   : > { %v929_v44 = vadd.f32 %v872_v5, %v871_v16  ;;  %v915_v5 = vadd.f32 %v914_v14, %v913_v4  ;;  %v879_v25 = vmax.f32 %v2065_v3, %v2188_v57  ;;  %v899_v39 = vadd.f32 %v898_v36, %v897_v43 }
 0x244   : > { %1020 = vmatpush.msrb.mxu1 %v985_v1 }
 0x245   : > { %v930_v10 = vadd.f32 %v929_v44, %v873_v63  ;;  %v916_v26 = vrot.slane %v915_v5, 2  ;;  %v947_v33 = vadd.f32 %v880_v11, %v879_v25  ;;  %v2320_v44 = vld [vmem:[#allocation6_spill] sm:$0xff]  ;;  %v900_v38 = vrot.slane %v899_v39, 1 }
 0x247   : > { %v917_v58 = vadd.f32 %v916_v26, %v915_v5  ;;  %v901_v35 = vadd.f32 %v900_v38, %v899_v39  ;;  %v1337_v5 = vld [vmem:[%s2300_s5] ss:$0 sm:$0xff] }
 0x248   : > { %v834_v55 = vpop.permute.xlu2 %833 }
 0x249   : > { %v874_v19 = vmax.f32 %v2104_v7, %v834_v55  ;;  %v887_v7 = vrot.slane %v886_v2, 4 }
 0x24a   : > { %v842_v17 = vpop.permute.xlu1 %841 }
 0x24b   : > { %v878_v29 = vmax.f32 %v2077_v56, %v842_v17  ;;  %v931_v27 = vadd.f32 %v930_v10, %v874_v19  ;;  %v1027_v56 = vld [vmem:[%s2299_s4 + $0x8] sm:$0xff]  ;;  %v888_v47 = vadd.f32 %v887_v7, %v886_v2  ;;  %v918_v17 = vrot.slane %v917_v58, 1 }
 0x24c   : > { %1051 = vmatpush.msrb.mxu2 %v1027_v56 }
 0x24d   : > { %v940_v59 = vadd.f32 %v939_v53, %v878_v29  ;;  %v932_v13 = vrot.slane %v931_v27, 4  ;;  %v919_v53 = vadd.f32 %v918_v17, %v917_v58 }
 0x24e   : > { %1052 = vmatpush.msrb.mxu2 %v1026_v41 }
 0x24f   : > { %v941_v9 = vrot.slane %v940_v59, 4  ;;  %v933_v12 = vadd.f32 %v932_v13, %v931_v27  ;;  %v1336_v13 = vld [vmem:[%s2298_s3] ss:$0 sm:$0xff] }
 0x250   : > { %v806_v50 = vpop.permute.xlu0 %805  ;;  %v850_v15 = vpop.permute.xlu2 %849 }
 0x251   : > { %v860_v6 = vmax.f32 %v2087_v60, %v806_v50  ;;  %v889_v60 = vrot.slane %v888_v47, 2  ;;  %v942_v16 = vadd.f32 %v941_v9, %v940_v59  ;;  %v934_v8 = vrot.slane %v933_v12, 2 }
 0x252   : > { %v882_v55 = vmax.f32 %v2320_v44, %v850_v15 }
 0x253   : > { %v902_v45 = vadd.f32 %v860_v6, %v859_v22  ;;  %v890_v61 = vadd.f32 %v889_v60, %v888_v47  ;;  %v943_v3 = vrot.slane %v942_v16, 2  ;;  %v935_v63 = vadd.f32 %v934_v8, %v933_v12 }
 0x255   : > { %v903_v52 = vadd.f32 %v902_v45, %v861_v48  ;;  %v891_v62 = vrot.slane %v890_v61, 1  ;;  %v944_v46 = vadd.f32 %v943_v3, %v942_v16  ;;  %v936_v31 = vrot.slane %v935_v63, 1 }
 0x257   : > { %v904_v18 = vadd.f32 %v903_v52, %v862_v23  ;;  %v892_v4 = vadd.f32 %v891_v62, %v890_v61  ;;  %v945_v10 = vrot.slane %v944_v46, 1  ;;  %v937_v59 = vadd.f32 %v936_v31, %v935_v63 }
 0x258   : > { %v848_v28 = vpop.permute.xlu0 %847 }
 0x259   : > { %v905_v32 = vrot.slane %v904_v18, 4  ;;  %v881_v37 = vmax.f32 %v2094_v24, %v848_v28  ;;  %v927_v24 = vrot.slane %v926_v20, 1  ;;  %v965_v30 = vsel %vm964_vm1, %v901_v35, %v892_v4 }
 0x25a   : > { %v946_v43 = vadd.f32 %v945_v10, %v944_v46 }
 0x25b   : > { %v906_v57 = vadd.f32 %v905_v32, %v904_v18  ;;  %v948_v1 = vadd.f32 %v947_v33, %v881_v37  ;;  %v928_v7 = vadd.f32 %v927_v24, %v926_v20 }
 0x25d   : > { %v907_v21 = vrot.slane %v906_v57, 2  ;;  %v949_v51 = vadd.f32 %v948_v1, %v882_v55 }
 0x25f   : > { %v908_v2 = vadd.f32 %v907_v21, %v906_v57  ;;  %v950_v19 = vrot.slane %v949_v51, 4 }
 0x261   : > { %v909_v34 = vrot.slane %v908_v2, 1  ;;  %v951_v29 = vadd.f32 %v950_v19, %v949_v51 }
 0x263   : > { %v910_v40 = vadd.f32 %v909_v34, %v908_v2  ;;  %v952_v42 = vrot.slane %v951_v29, 2 }
 0x265   : > { %v953_v27 = vadd.f32 %v952_v42, %v951_v29  ;;  %v967_v56 = vsel %vm966_vm2, %v910_v40, %v965_v30 }
 0x266   : > { %v969_v14 = vsel %vm968_vm3, %v919_v53, %v967_v56 }
 0x267   : > { %v954_v50 = vrot.slane %v953_v27, 1  ;;  %v971_v41 = vsel %vm970_vm4, %v928_v7, %v969_v14 }
 0x268   : > { %v973_v49 = vsel %vm972_vm5, %v937_v59, %v971_v41 }
 0x269   : > { %v955_v22 = vadd.f32 %v954_v50, %v953_v27  ;;  %v975_v6 = vsel %vm974_vm6, %v946_v43, %v973_v49 }
 0x26b   : > { %v977_v47 = vsel %vm976_vm7, %v955_v22, %v975_v6 }
 0x26c   : > { %1021 = vmatmul.f32.vlgmr.msrb.gmra.mxu1 %v977_v47 }
 0x2e9   : > { %v1022_v48 = vpop.f32.mrf.mxu1 }
 0x2ea   : > { %v1023_v9 = vadd.f32 %v1336_v13, %v1022_v48 }
 0x2ec   : > { %v1025_v45 = vmax.f32 %v1023_v9, 0.0 }
 0x2ee   : > { %1247 = vmatmul.msk.f32.vlgmr.msrb.gmra.mxu2 %vm425_vm0, %v1025_v45 }
 0x371   : > { %v1054_v36 = vpop.f32.mrf.mxu2 }
 0x372   : > { %v1055_v23 = vadd.f32 %v1337_v5, %v1054_v36 }
 0x374   : > { %v1058_v54 = vsel %vm1057_vm8, %v1055_v23, -inf }
 0x375   : > { %1059 = vmax.xlane.f32.xlu0 %v1058_v54 }
 0x3e8   : > { %v1060_v25 = vpop.xlane.xlu0 %1059 }
 0x3e9   : > { %v1061_v52 = vsub.f32 %v1055_v23, %v1060_v25 }
 0x3eb   : > { %v1062_v60 = vmul.f32 1.442695, %v1061_v52 }
 0x3ed   : > { %1338 = vpow2.f32 %v1062_v60 }
 0x3f3   : > { %v1339_v12 = vpop.eup %1338 }
 0x3f4   : > { %v1064_v11 = vsel %vm1057_vm8, %v1339_v12, 0.0 }
 0x3f5   : > { %1065 = vadd.xlane.f32.xlu1 %v1064_v11 }
 0x468   : > { %v1066_v16 = vpop.xlane.xlu1 %1065 }
 0x469   : > { %1340 = vlog2.f32 %v1066_v16 }
 0x46f   : > { %v1341_v18 = vpop.eup %1340 }
 0x470   : > { %v1068_v26 = vmul.f32 0.6931472, %v1341_v18 }
 0x472   : > { %v1069_v39 = vadd.f32 %v1068_v26, %v1060_v25 }
 0x474   : > { %v1070_v15 = vsub.f32 %v1055_v23, %v1069_v39 }
 0x476   : > { %1071 = vst.msk [vmem:[%s290_s13] sm:$0xff] %vm1057_vm8, %v1070_v15 }
 0x477 PF: > { %s19_s26 = sadd.s32 1, %s1422_s26   ;;  %s2321_s21 = smov %s1406_s22 }
 0x478   : > { %p16_p0 = scmp.ge.s32.totalorder %s19_s26, 4   ;;  %s2322_s22 = smov %s1410_s23 }
 0x479   : > { %s2323_s23 = smov %s1513_s9  ;;  %s2324_s24 = smov %s1418_s25 }
 0x47a   : > { %s2325_s25 = smov %s2327_s28  ;;  %18 = sbr.rel (!%p16_p0) target bundleno = 4 (0x4), region = 92 }
 0x47f   :  { %1091 = vsyncpa [#allocation4], 1 }
 0x480   :  { %1093 = vsyncpa [#allocation4 + $0x1], 1 }

</bundles_post_ra>
